<compile_context>
chip_gen: v7x
topology: tpu7x:2x2x1
jax: 0.10.0
libtpu: 0.0.40
codegen_flags: <defaults>
</compile_context>

<pallas_src>
import jax
import jax.numpy as jnp
import numpy as np
from jax.experimental import pallas as pl
from jax.experimental.pallas import tpu as pltpu


def _round_up(x, m):
    return ((x + m - 1) // m) * m


def _cdiv(a, b):
    return -(-a // b)


def _predictor_kernel(enc_ref, t_ref, m_ref, wp_ref, bp_ref, sel_ref, wc_ref,
                      bc_ref, out_ref):
    # enc_ref: [1, NR, D]   original dtype (f32); cast to matmul dtype in-register
    # t_ref:   [1, NR, K]   f32 time samples, row-aligned with enc rows
    # m_ref:   [1, NR, 1]   f32 shifted non-pad mask (= non_pad_mask[:, 1:])
    # wp_ref:  [D, 2*GHp]   fused projection weight [Wa tiled G times | Wb tiled]
    # bp_ref:  [1, 2*GHp]   fused projection bias
    # sel_ref: [NG, K, GHp] 0/1 lane-expansion selectors for the time samples
    # wc_ref:  [GHp, G*T]   block-diagonal classifier weight
    # bc_ref:  [1, G*T]     tiled classifier bias
    # out_ref: [1, NR, NG*G*T] f32
    ghp = wp_ref.shape[1] // 2
    ng = sel_ref.shape[0]
    gt = wc_ref.shape[1]
    mm_dtype = wp_ref.dtype

    x = enc_ref[0].astype(mm_dtype)                       # f32 -> bf16 in-register
    # Fused projection: one MXU pass for both (lane-replicated) affect and base.
    proj = jnp.dot(x, wp_ref[...],
                   preferred_element_type=jnp.float32) + bp_ref[...]
    affect = jnp.tanh(proj[:, :ghp])                      # [NR, GHp]
    base = proj[:, ghp:]                                  # [NR, GHp]

    t_blk = t_ref[0]                                      # [NR, K] f32
    m_blk = m_ref[0]                                      # [NR, 1] f32
    bias = bc_ref[...]                                    # [1, G*T]
    w_cls = wc_ref[...]                                   # [GHp, G*T]

    # TODO(synk): switch to lax.fori_loop (dynamic sel_ref[g] / pl.ds lane store)
    # if NG ever grows beyond ~8, to bound live ranges.
    for g in range(ng):
        # MXU lane-broadcast: column j of t_exp is t[:, sample(g, j // H)].
        t_exp = jnp.dot(t_blk, sel_ref[g], preferred_element_type=jnp.float32)
        z = jnp.tanh(affect * t_exp + base)               # one tanh covers G samples
        logits = jnp.dot(z.astype(mm_dtype), w_cls,
                         preferred_element_type=jnp.float32) + bias
        out_ref[0, :, g * gt:(g + 1) * gt] = (logits * m_blk).astype(out_ref.dtype)


def predictor_with_time(enc, t, non_pad_mask, params, *,
                        matmul_dtype=jnp.bfloat16, row_tile=1024):
    """Predictor_with_time.forward(enc) followed by get_type(t, non_pad_mask).

    enc:          [B, L, D]
    t:            [B, L-1, K]  (or [B, L-1] -> treated as K=1, like unsqueeze(2))
    non_pad_mask: [B, L, 1]
    params:       (Wa [D,H], ba [1,H], Wb [D,H], bb [1,H], Wc [H,T], bc [1,T])
    returns:      [B, L-1, K, T] float32
    """
    if t.ndim == 2:
        t = t[:, :, None]
    assert t.ndim == 3

    B, L, D = enc.shape
    Lm1 = L - 1
    K = t.shape[-1]
    assert t.shape[1] == Lm1

    wa, ba, wb, bb, wc, bc = params
    H = wa.shape[1]
    T = wc.shape[1]

    # ---- lane packing: G time samples share one 128-lane group -----------------
    G = min(K, max(1, 128 // H))
    NG = _cdiv(K, G)
    GH = G * H
    GHp = _round_up(GH, 128)     # affect/base split lands on a vreg boundary
    GT = G * T
    KTo = NG * GT                # packed output width (= ceil(K/G) * G * T)

    # ---- row tiling over the (L-1) predicted positions, per batch --------------
    if Lm1 >= 8:
        NR = max(8, min(row_tile, (L // 8) * 8))
    else:
        NR = 8
    n_tiles = _cdiv(Lm1, NR)
    # v7x has 2 TensorCores: keep >= 2 grid steps when there is enough work to split.
    if B * n_tiles < 2 and Lm1 > 8:
        NR = _round_up(_cdiv(Lm1, 2), 8)
        n_tiles = _cdiv(Lm1, NR)
    RT = n_tiles * NR

    if L < NR:                   # degenerate tiny-L case only
        enc = jnp.pad(enc, ((0, 0), (0, NR - L), (0, 0)))

    # Per-row side inputs built at RT rows (tiny vs enc; enc itself is NOT copied).
    t_rows = jnp.zeros((B, RT, K), jnp.float32)
    t_rows = t_rows.at[:, :Lm1, :].set(t.astype(jnp.float32))
    m_rows = jnp.zeros((B, RT, 1), jnp.float32)
    m_rows = m_rows.at[:, :Lm1, :].set(non_pad_mask[:, 1:, :].astype(jnp.float32))

    # ---- weight packing (cheap one-off XLA ops outside the kernel) -------------
    f32 = jnp.float32
    w_proj = jnp.zeros((D, 2 * GHp), f32)
    w_proj = w_proj.at[:, :GH].set(jnp.tile(wa.astype(f32), (1, G)))
    w_proj = w_proj.at[:, GHp:GHp + GH].set(jnp.tile(wb.astype(f32), (1, G)))
    b_proj = jnp.zeros((1, 2 * GHp), f32)
    b_proj = b_proj.at[:, :GH].set(jnp.tile(ba.reshape(1, H).astype(f32), (1, G)))
    b_proj = b_proj.at[:, GHp:GHp + GH].set(
        jnp.tile(bb.reshape(1, H).astype(f32), (1, G)))

    # Block-diagonal classifier: slot s maps lanes [s*H,(s+1)*H) -> cols [s*T,(s+1)*T).
    w_cls = jnp.zeros((GHp, GT), f32)
    for s in range(G):
        w_cls = w_cls.at[s * H:(s + 1) * H, s * T:(s + 1) * T].set(wc.astype(f32))
    b_cls = jnp.tile(bc.reshape(1, T).astype(f32), (1, G))

    # 0/1 selectors expanding t[:, k] over the H lanes of its slot (constants).
    sel_np = np.zeros((NG, K, GHp), np.float32)
    for g in range(NG):
        for s in range(G):
            k_idx = g * G + s
            if k_idx < K:
                sel_np[g, k_idx, s * H:(s + 1) * H] = 1.0
    sel = jnp.asarray(sel_np)

    w_proj_c = w_proj.astype(matmul_dtype)
    w_cls_c = w_cls.astype(matmul_dtype)

    out = pl.pallas_call(
        _predictor_kernel,
        out_shape=jax.ShapeDtypeStruct((B, RT, KTo), jnp.float32),
        grid=(B, n_tiles),
        in_specs=[
            pl.BlockSpec((1, NR, D), lambda b, i: (b, i, 0)),     # enc (no wrapper copy)
            pl.BlockSpec((1, NR, K), lambda b, i: (b, i, 0)),     # time samples
            pl.BlockSpec((1, NR, 1), lambda b, i: (b, i, 0)),     # shifted pad mask
            pl.BlockSpec((D, 2 * GHp), lambda b, i: (0, 0)),      # fused projection W
            pl.BlockSpec((1, 2 * GHp), lambda b, i: (0, 0)),      # fused projection b
            pl.BlockSpec((NG, K, GHp), lambda b, i: (0, 0, 0)),   # t lane-expansion sel
            pl.BlockSpec((GHp, GT), lambda b, i: (0, 0)),         # block-diag classifier W
            pl.BlockSpec((1, GT), lambda b, i: (0, 0)),           # tiled classifier b
        ],
        out_specs=pl.BlockSpec((1, NR, KTo), lambda b, i: (b, i, 0)),
        compiler_params=pltpu.CompilerParams(
            dimension_semantics=("parallel", "parallel"),
            vmem_limit_bytes=32 * 1024 * 1024),
    )(enc, t_rows, m_rows, w_proj_c, b_proj, sel, w_cls_c, b_cls)

    # Drop padded rows / padded sample slots and restore [B, L-1, K, T].
    return out[:, :Lm1, :K * T].reshape(B, Lm1, K, T)


def _reference(enc, t, non_pad_mask, params):
    """Plain-JAX (f32) re-statement of the PyTorch module, for verification."""
    if t.ndim == 2:
        t = t[:, :, None]
    wa, ba, wb, bb, wc, bc = params
    affect = jnp.tanh(enc @ wa + ba[0])
    base = enc @ wb + bb[0]
    out = jnp.tanh(affect[:, :-1, None, :] * t[:, :, :, None]
                   + base[:, :-1, None, :])
    out = out @ wc + bc[0]
    out = out * non_pad_mask[:, 1:, :, None]
    return out


if __name__ == "__main__":
    # Small shapes consistent with the module.
    B, L, dim, num_types, K = 2, 8, 32, 8, 4
    H = dim // 2

    key = jax.random.PRNGKey(0)
    keys = jax.random.split(key, 9)

    # Deterministic synthetic parameters (nn.Linear shapes, stored as [in, out]).
    scale_d = 1.0 / jnp.sqrt(dim)
    scale_h = 1.0 / jnp.sqrt(H)
    wa = jax.random.uniform(keys[0], (dim, H), jnp.float32, -scale_d, scale_d)
    ba = jax.random.uniform(keys[1], (1, H), jnp.float32, -scale_d, scale_d)
    wb = jax.random.uniform(keys[2], (dim, H), jnp.float32, -scale_d, scale_d)
    bb = jax.random.uniform(keys[3], (1, H), jnp.float32, -scale_d, scale_d)
    wc = jax.random.uniform(keys[4], (H, num_types), jnp.float32, -scale_h, scale_h)
    bc = jax.random.uniform(keys[5], (1, num_types), jnp.float32, -scale_h, scale_h)
    params = (wa, ba, wb, bb, wc, bc)

    # Inputs.
    enc = jax.random.normal(keys[6], (B, L, dim), jnp.float32)
    t = jax.random.uniform(keys[7], (B, L - 1, K), jnp.float32)
    mask = jnp.ones((B, L, 1), jnp.float32)
    mask = mask.at[1, L - 2:, :].set(0.0)

    ref = _reference(enc, t, mask, params)

    # f32 matmul path: must match the reference tightly.
    out_f32 = predictor_with_time(enc, t, mask, params, matmul_dtype=jnp.float32)
    out_f32 = jax.block_until_ready(out_f32)
    assert out_f32.shape == (B, L - 1, K, num_types), out_f32.shape
    assert jnp.allclose(out_f32, ref, atol=1e-4, rtol=1e-4), \
        f"f32 path: max abs err = {jnp.max(jnp.abs(out_f32 - ref))}"

    # bf16 MXU path (default): loose tolerance vs the f32 reference.
    out_bf16 = predictor_with_time(enc, t, mask, params)
    out_bf16 = jax.block_until_ready(out_bf16)
    assert out_bf16.shape == (B, L - 1, K, num_types), out_bf16.shape
    assert jnp.allclose(out_bf16, ref, atol=5e-2, rtol=5e-2), \
        f"bf16 path: max abs err = {jnp.max(jnp.abs(out_bf16 - ref))}"

    print("KERNEL_OK")
</pallas_src>

<mosaic_0001>
module attributes {stable_mosaic.version = 11 : i64} {
  func.func @_predictor_kernel(%arg0: i32, %arg1: i32, %arg2: memref<1x8x32xf32, #tpu.memory_space<vmem>>, %arg3: memref<1x8x4xf32, #tpu.memory_space<vmem>>, %arg4: memref<1x8x1xf32, #tpu.memory_space<vmem>>, %arg5: memref<32x256xf32, #tpu.memory_space<vmem>>, %arg6: memref<1x256xf32, #tpu.memory_space<vmem>>, %arg7: memref<1x4x128xf32, #tpu.memory_space<vmem>>, %arg8: memref<128x32xf32, #tpu.memory_space<vmem>>, %arg9: memref<1x32xf32, #tpu.memory_space<vmem>>, %arg10: memref<1x8x32xf32, #tpu.memory_space<vmem>>) attributes {dimension_semantics = [#tpu.dimension_semantics<parallel>, #tpu.dimension_semantics<parallel>], iteration_bounds = array<i64: 2, 1>, scalar_prefetch = 0 : i64, scratch_operands = 0 : i64, tpu.core_type = #tpu.core_type<tc>, window_params = [{transform_indices = @transform_0, window_bounds = array<i64: 1, 8, 32>}, {transform_indices = @transform_1, window_bounds = array<i64: 1, 8, 4>}, {transform_indices = @transform_2, window_bounds = array<i64: 1, 8, 1>}, {pipeline_mode = #tpu.pipeline_mode<synchronous>, transform_indices = @transform_3, window_bounds = array<i64: 32, 256>}, {pipeline_mode = #tpu.pipeline_mode<synchronous>, transform_indices = @transform_4, window_bounds = array<i64: 1, 256>}, {pipeline_mode = #tpu.pipeline_mode<synchronous>, transform_indices = @transform_5, window_bounds = array<i64: 1, 4, 128>}, {pipeline_mode = #tpu.pipeline_mode<synchronous>, transform_indices = @transform_6, window_bounds = array<i64: 128, 32>}, {pipeline_mode = #tpu.pipeline_mode<synchronous>, transform_indices = @transform_7, window_bounds = array<i64: 1, 32>}, {transform_indices = @transform_8, window_bounds = array<i64: 1, 8, 32>}]} {
    %c0 = arith.constant 0 : index
    %c0_0 = arith.constant 0 : index
    %c0_1 = arith.constant 0 : index
    %0 = vector.load %arg2[%c0, %c0_0, %c0_1] : memref<1x8x32xf32, #tpu.memory_space<vmem>>, vector<1x8x32xf32>
    %1 = vector.shape_cast %0 : vector<1x8x32xf32> to vector<8x32xf32>
    %c0_2 = arith.constant 0 : index
    %c0_3 = arith.constant 0 : index
    %2 = vector.load %arg5[%c0_2, %c0_3] : memref<32x256xf32, #tpu.memory_space<vmem>>, vector<32x256xf32>
    %cst = arith.constant dense<0.000000e+00> : vector<8x256xf32>
    %3 = tpu.matmul %1, %2, %cst {dimension_numbers = #tpu.dot_dimension_numbers<[1], [0], [0], [1], [0, 0, 1, 1], [], []>} : vector<8x32xf32>, vector<32x256xf32>, vector<8x256xf32> -> vector<8x256xf32>
    %c0_4 = arith.constant 0 : index
    %c0_5 = arith.constant 0 : index
    %4 = vector.load %arg6[%c0_4, %c0_5] : memref<1x256xf32, #tpu.memory_space<vmem>>, vector<1x256xf32>
    %5 = vector.broadcast %4 : vector<1x256xf32> to vector<8x256xf32>
    %6 = arith.addf %3, %5 : vector<8x256xf32>
    %7 = vector.extract_strided_slice %6 {offsets = [0, 0], sizes = [8, 128], strides = [1, 1]} : vector<8x256xf32> to vector<8x128xf32>
    %8 = math.tanh %7 : vector<8x128xf32>
    %9 = vector.extract_strided_slice %6 {offsets = [0, 128], sizes = [8, 128], strides = [1, 1]} : vector<8x256xf32> to vector<8x128xf32>
    %c0_6 = arith.constant 0 : index
    %c0_7 = arith.constant 0 : index
    %c0_8 = arith.constant 0 : index
    %10 = vector.load %arg3[%c0_6, %c0_7, %c0_8] : memref<1x8x4xf32, #tpu.memory_space<vmem>>, vector<1x8x4xf32>
    %11 = vector.shape_cast %10 : vector<1x8x4xf32> to vector<8x4xf32>
    %c0_9 = arith.constant 0 : index
    %c0_10 = arith.constant 0 : index
    %c0_11 = arith.constant 0 : index
    %12 = vector.load %arg4[%c0_9, %c0_10, %c0_11] : memref<1x8x1xf32, #tpu.memory_space<vmem>>, vector<1x8x1xf32>
    %13 = vector.shape_cast %12 : vector<1x8x1xf32> to vector<8x1xf32>
    %c0_12 = arith.constant 0 : index
    %c0_13 = arith.constant 0 : index
    %14 = vector.load %arg9[%c0_12, %c0_13] : memref<1x32xf32, #tpu.memory_space<vmem>>, vector<1x32xf32>
    %c0_14 = arith.constant 0 : index
    %c0_15 = arith.constant 0 : index
    %15 = vector.load %arg8[%c0_14, %c0_15] : memref<128x32xf32, #tpu.memory_space<vmem>>, vector<128x32xf32>
    %c0_16 = arith.constant 0 : index
    %c0_17 = arith.constant 0 : index
    %c0_18 = arith.constant 0 : index
    %16 = vector.load %arg7[%c0_16, %c0_17, %c0_18] : memref<1x4x128xf32, #tpu.memory_space<vmem>>, vector<1x4x128xf32>
    %17 = vector.shape_cast %16 : vector<1x4x128xf32> to vector<4x128xf32>
    %cst_19 = arith.constant dense<0.000000e+00> : vector<8x128xf32>
    %18 = tpu.matmul %11, %17, %cst_19 {dimension_numbers = #tpu.dot_dimension_numbers<[1], [0], [0], [1], [0, 0, 1, 1], [], []>} : vector<8x4xf32>, vector<4x128xf32>, vector<8x128xf32> -> vector<8x128xf32>
    %19 = arith.mulf %8, %18 : vector<8x128xf32>
    %20 = arith.addf %19, %9 : vector<8x128xf32>
    %21 = math.tanh %20 : vector<8x128xf32>
    %cst_20 = arith.constant dense<0.000000e+00> : vector<8x32xf32>
    %22 = tpu.matmul %21, %15, %cst_20 {dimension_numbers = #tpu.dot_dimension_numbers<[1], [0], [0], [1], [0, 0, 1, 1], [], []>} : vector<8x128xf32>, vector<128x32xf32>, vector<8x32xf32> -> vector<8x32xf32>
    %23 = vector.broadcast %14 : vector<1x32xf32> to vector<8x32xf32>
    %24 = arith.addf %22, %23 : vector<8x32xf32>
    %25 = vector.broadcast %13 : vector<8x1xf32> to vector<8x32xf32>
    %26 = arith.mulf %24, %25 : vector<8x32xf32>
    %c0_21 = arith.constant 0 : index
    %c0_22 = arith.constant 0 : index
    %c0_23 = arith.constant 0 : index
    %27 = vector.load %arg10[%c0_21, %c0_22, %c0_23] : memref<1x8x32xf32, #tpu.memory_space<vmem>>, vector<1x8x32xf32>
    %28 = vector.shape_cast %27 : vector<1x8x32xf32> to vector<8x32xf32>
    %29 = vector.shape_cast %26 : vector<8x32xf32> to vector<1x8x32xf32>
    tpu.vector_store %arg10[%c0_21, %c0_22, %c0_23], %29 {strides = array<i32>} : memref<1x8x32xf32, #tpu.memory_space<vmem>>, vector<1x8x32xf32>,
    return
  }
  func.func @transform_0(%arg0: i32, %arg1: i32) -> (i32, i32, i32) {
    %c0_i32 = arith.constant 0 : i32
    %c0_i32_0 = arith.constant 0 : i32
    return %arg0, %arg1, %c0_i32 : i32, i32, i32
  }
  func.func @transform_1(%arg0: i32, %arg1: i32) -> (i32, i32, i32) {
    %c0_i32 = arith.constant 0 : i32
    %c0_i32_0 = arith.constant 0 : i32
    return %arg0, %arg1, %c0_i32 : i32, i32, i32
  }
  func.func @transform_2(%arg0: i32, %arg1: i32) -> (i32, i32, i32) {
    %c0_i32 = arith.constant 0 : i32
    %c0_i32_0 = arith.constant 0 : i32
    return %arg0, %arg1, %c0_i32 : i32, i32, i32
  }
  func.func @transform_3(%arg0: i32, %arg1: i32) -> (i32, i32) {
    %c0_i32 = arith.constant 0 : i32
    %c0_i32_0 = arith.constant 0 : i32
    %c0_i32_1 = arith.constant 0 : i32
    return %c0_i32, %c0_i32_0 : i32, i32
  }
  func.func @transform_4(%arg0: i32, %arg1: i32) -> (i32, i32) {
    %c0_i32 = arith.constant 0 : i32
    %c0_i32_0 = arith.constant 0 : i32
    %c0_i32_1 = arith.constant 0 : i32
    return %c0_i32, %c0_i32_0 : i32, i32
  }
  func.func @transform_5(%arg0: i32, %arg1: i32) -> (i32, i32, i32) {
    %c0_i32 = arith.constant 0 : i32
    %c0_i32_0 = arith.constant 0 : i32
    %c0_i32_1 = arith.constant 0 : i32
    %c0_i32_2 = arith.constant 0 : i32
    return %c0_i32, %c0_i32_0, %c0_i32_1 : i32, i32, i32
  }
  func.func @transform_6(%arg0: i32, %arg1: i32) -> (i32, i32) {
    %c0_i32 = arith.constant 0 : i32
    %c0_i32_0 = arith.constant 0 : i32
    %c0_i32_1 = arith.constant 0 : i32
    return %c0_i32, %c0_i32_0 : i32, i32
  }
  func.func @transform_7(%arg0: i32, %arg1: i32) -> (i32, i32) {
    %c0_i32 = arith.constant 0 : i32
    %c0_i32_0 = arith.constant 0 : i32
    %c0_i32_1 = arith.constant 0 : i32
    return %c0_i32, %c0_i32_0 : i32, i32
  }
  func.func @transform_8(%arg0: i32, %arg1: i32) -> (i32, i32, i32) {
    %c0_i32 = arith.constant 0 : i32
    %c0_i32_0 = arith.constant 0 : i32
    return %arg0, %arg1, %c0_i32 : i32, i32, i32
  }
}

</mosaic_0001>

<bundles_post_ra>
// kernel: tpu_custom_call.1
= control target key start
LH: loop header
LB: loop body
LE: loop exit
PB: predicated region body
PF: predicated region fallthrough
CT: control target
= control target key end

     0   :  { %13 = vsyncpa [#allocation3], 0  ;;  %s1289_s0 = inlined_call_operand.vmem [shape: f32[2,8,32], index: 0, kind: input, shape index: {}]   ;;  %s1290_s1 = inlined_call_operand.vmem [shape: f32[2,8,4], index: 1, kind: input, shape index: {}]   ;;  %s1291_s2 = inlined_call_operand.vmem [shape: f32[2,8,1], index: 2, kind: input, shape index: {}]   ;;  %s1292_s3 = inlined_call_operand.vmem [shape: f32[32,256], index: 3, kind: input, shape index: {}]   ;;  %s1293_s4 = inlined_call_operand.vmem [shape: f32[1,256], index: 4, kind: input, shape index: {}]   ;;  %s1294_s5 = inlined_call_operand.vmem [shape: f32[1,4,128], index: 5, kind: input, shape index: {}]   ;;  %s1295_s6 = inlined_call_operand.vmem [shape: f32[128,32], index: 6, kind: input, shape index: {}]   ;;  %s1296_s7 = inlined_call_operand.vmem [shape: f32[1,32], index: 7, kind: input, shape index: {}]   ;;  %s1297_s8 = inlined_call_operand.hbm [shape: f32[2,8,32], index: 8, kind: output, shape index: {}]  }
   0x1   :  { %15 = vsyncpa [#allocation3 + $0x1], 0  ;;  %s1081_s27 = smov 0   ;;  %s1083_s28 = smov 0  }
   0x2   :  { %s1085_s29 = smov 0   ;;  %s1087_s30 = smov 0  }
   0x3   :  { %s1089_s9 = smov 0   ;;  %s1091_s10 = smov 0  }
   0x4 LB: > { %s779_s11 = sadd.s32 4294967295, %s1029_s10   ;;  %s780_s12 = sadd.s32 4294967294, %s1029_s10   ;;  %s1029_s10 = sphi %s1091_s10, %s21_s10   ;;  %s1025_s9 = sphi %s1089_s9, %s1304_s9   ;;  %s1021_s30 = sphi %s1087_s30, %s1303_s30   ;;  %s1017_s29 = sphi %s1085_s29, %s1302_s29   ;;  %s1013_s28 = sphi %s1083_s28, %s1301_s28   ;;  %s1009_s27 = sphi %s1081_s27, %s1300_s27  }
   0x5   : > { %s33_s13 = sadd.s32 1, %s1025_s9  ;;  %s231_s14 = sadd.s32 1, %s1017_s29 }
   0x6   : > { %p35_p0 = scmp.ge.s32.totalorder %s33_s13, 2  ;;  %p241_p1 = scmp.ne.s32.totalorder %s1017_s29, %s1013_s28 }
   0x7   : > { %p242_p2 = scmp.eq.s32.totalorder %s779_s11, 1  ;;  %p247_p3 = scmp.ne.s32.totalorder %s1013_s28, %s1009_s27 }
   0x8   : > { %s1306_s13 = smov (%p35_p0, %s33_s13), 0  ;;  %p248_p5 = scmp.eq.s32.totalorder %s780_s12, 1 }
   0x9   : > { %p1121_p4 = por %p242_p2, %p241_p1  ;;  %s226_s16 = ssub.s32 %s1025_s9, %s1306_s13 }
   0xa   : > { %p783_p6 = scmp.ge.s32.totalorder %s1029_s10, 1  ;;  %p229_p7 = scmp.eq.s32.totalorder %s226_s16, 0 }
   0xb   : > { %p1128_p8 = por %p248_p5, %p247_p3  ;;  %p311_p9 = scmp.lt.s32.totalorder %s1029_s10, 3 }
   0xc   : > { %s1134_s18 = scalar_select %p229_p7, %s1017_s29, %s231_s14  }
   0xd   : > { %p312_p10 = pnand %p783_p6, %p311_p9 }
   0xe   : > { %v384_v0 = vld [vmem:[%s1292_s3 + $0x8] sm:$0xff] (!%p312_p10)  ;;  %v386_v1 = vld [vmem:[%s1292_s3 + $0x18] sm:$0xff] (!%p312_p10)  ;;  %v383_v2 = vld [vmem:[%s1292_s3] sm:$0xff] (!%p312_p10)  ;;  %p361_p11 = scmp.lt.s32.totalorder (!%p312_p10), %s1021_s30, 1  ;;  %v1031_v7 = vmov (!%p312_p10), 0.0   ;;  %vm1032_vm0 = vmmov (!%p312_p10), 0   ;;  %v393_v43 = vlaneseq (!%p312_p10) }
   0xf   : > { %315 = sbr.rel (%p312_p10) target bundleno = 497 (0x1f1), region = 52  ;;  %v855_v3 = vpack.c.bf16 (!%p312_p10), %v386_v1, %v384_v0  ;;  %v385_v4 = vld [vmem:[%s1292_s3 + $0x10] sm:$0xff] (!%p312_p10)  ;;  %v388_v5 = vld [vmem:[%s1292_s3 + $0x28] sm:$0xff] (!%p312_p10)  ;;  %v390_v6 = vld [vmem:[%s1292_s3 + $0x38] sm:$0xff] (!%p312_p10)  ;;  %471 = vmatprep.mubr.f32.mxu0 (!%p312_p10), %v1031_v7  ;;  %852 = vmatprep.mubr.msk.f32.mxu1 (!%p312_p10), %vm1032_vm0, %v1031_v7  ;;  %v1033_v12 = vmov (!%p312_p10), 0.0|0.0   ;;  %vm403_vm1 = vcmask (!%p312_p10), 261120  }
  0x10   : > { %v857_v8 = vpack.c.bf16 (!%p312_p10), %v385_v4, %v383_v2  ;;  %v859_v9 = vpack.c.bf16 (!%p312_p10), %v390_v6, %v388_v5  ;;  %v387_v10 = vld [vmem:[%s1292_s3 + $0x20] sm:$0xff] (!%p312_p10)  ;;  %v389_v11 = vld [vmem:[%s1292_s3 + $0x30] sm:$0xff] (!%p312_p10)  ;;  %863 = vmatprep.subr.bf16.mxu1 (!%p312_p10), %v1033_v12  ;;  %v483_v14 = vld [vmem:[%s1295_s6 + $0x8] sm:$0xff] (!%p312_p10)  ;;  %vm503_vm2 = vcmask (!%p312_p10), 1043456   ;;  %vm499_vm3 = vcmask (!%p312_p10), 31744   ;;  %s793_s14 = sshll.u32 (!%p312_p10), %s1021_s30, 7 }
  0x11   : > { %856 = vmatprep.subr.bf16.mxu0 (!%p312_p10), %v855_v3  ;;  %v482_v13 = vld [vmem:[%s1295_s6] sm:$0xff] (!%p312_p10)  ;;  %v861_v15 = vpack.c.bf16 (!%p312_p10), %v389_v11, %v387_v10  ;;  %v484_v20 = vld [vmem:[%s1295_s6 + $0x10] sm:$0xff] (!%p312_p10)  ;;  %v485_v21 = vld [vmem:[%s1295_s6 + $0x18] sm:$0xff] (!%p312_p10)  ;;  %v1034_v41 = vmov (!%p312_p10), 0   ;;  %v394_v44 = vshrl.u32 (!%p312_p10), %v393_v43, 7 }
  0x12   : > { %858 = vmatpush1.bf16.msra.mxu0 (!%p312_p10), %v857_v8  ;;  %v864_v16 = vpack.c.bf16 (!%p312_p10), %v483_v14, %v482_v13  ;;  %v498_v18 = vld [vmem:[%s1294_s5] sm:$0xf] (!%p312_p10)  ;;  %v867_v22 = vpack.c.bf16 (!%p312_p10), %v485_v21, %v484_v20  ;;  %v487_v24 = vld [vmem:[%s1295_s6 + $0x28] sm:$0xff] (!%p312_p10)  ;;  %v488_v25 = vld [vmem:[%s1295_s6 + $0x30] sm:$0xff] (!%p312_p10)  ;;  %946 = vset.pattern.permute.xlu0 (!%p312_p10), %v1034_v41 }
  0x13   : > { %860 = vmatprep.subr.bf16.mxu0 (!%p312_p10), %v859_v9  ;;  %v486_v23 = vld [vmem:[%s1295_s6 + $0x20] sm:$0xff] (!%p312_p10)  ;;  %v489_v27 = vld [vmem:[%s1295_s6 + $0x38] sm:$0xff] (!%p312_p10)  ;;  %v491_v30 = vld [vmem:[%s1295_s6 + $0x48] sm:$0xff] (!%p312_p10)  ;;  %v395_v45 = vsub.s32 (!%p312_p10), 0, %v394_v44  ;;  %v399_v53 = vsub.s32 (!%p312_p10), 1, %v394_v44 }
  0x14   : > { %865 = vmatpush3.bf16.msra.mxu1 (!%p312_p10), %v864_v16  ;;  %v870_v26 = vpack.c.bf16 (!%p312_p10), %v487_v24, %v486_v23  ;;  %v873_v28 = vpack.c.bf16 (!%p312_p10), %v489_v27, %v488_v25  ;;  %v490_v29 = vld [vmem:[%s1295_s6 + $0x40] sm:$0xff] (!%p312_p10)  ;;  %v492_v32 = vld [vmem:[%s1295_s6 + $0x50] sm:$0xff] (!%p312_p10)  ;;  %v493_v33 = vld [vmem:[%s1295_s6 + $0x58] sm:$0xff] (!%p312_p10) }
  0x15   : > { %866 = vmatprep.subr.bf16.mxu1 (!%p312_p10), %v1033_v12  ;;  %v876_v31 = vpack.c.bf16 (!%p312_p10), %v491_v30, %v490_v29  ;;  %v879_v34 = vpack.c.bf16 (!%p312_p10), %v493_v33, %v492_v32  ;;  %v494_v35 = vld [vmem:[%s1295_s6 + $0x60] sm:$0xff] (!%p312_p10)  ;;  %v495_v36 = vld [vmem:[%s1295_s6 + $0x68] sm:$0xff] (!%p312_p10)  ;;  %v496_v38 = vld [vmem:[%s1295_s6 + $0x70] sm:$0xff] (!%p312_p10) }
  0x16   : > { %s362_s23 = scalar_select %p361_p11, %s1021_s30, 1  ;;  %862 = vmatpush1.bf16.msra.mxu0 %v861_v15  ;;  %v882_v37 = vpack.c.bf16 %v495_v36, %v494_v35  ;;  %v497_v39 = vld [vmem:[%s1295_s6 + $0x78] sm:$0xff]  ;;  %v391_v46 = vld [vmem:[%s1293_s4] sm:$0x3] }
  0x17   : > { %815 = vmatprep.subr.mxu0 %v1031_v7  ;;  %v885_v40 = vpack.c.bf16 %v497_v39, %v496_v38  ;;  %v396_v47 = vrot.slane %v391_v46, %v395_v45  ;;  %v400_v54 = vrot.slane %v391_v46, %v399_v53  ;;  %v791_v60 = vld [vmem:[%s1296_s7] ss:$0 sm:$0xff]  ;;  %s1035_s30 = smov [#allocation2]  }
  0x18   : > { %s1169_s12 = sshll.u32 %s362_s23, 3  ;;  %868 = vmatpush3.bf16.msra.mxu1 %v867_v22 }
  0x19   : > { %s367_s19 = scalar_lea.vmem %s1289_s0, %s1169_s12  ;;  %s374_s24 = scalar_lea.vmem %s1290_s1, %s1169_s12  ;;  %869 = vmatprep.subr.bf16.mxu1 %v1033_v12 }
  0x1a   : > { %v382_v17 = vld [vmem:[%s367_s19] sm:$0xff]  ;;  %s381_s22 = scalar_lea.vmem %s1291_s2, %s1169_s12  ;;  %s358_s12 = sand.u32 1, %s1013_s28  }
  0x1b   : > { %788 = vmatmul.mubr.msk.f32.vlgmr.msra.gmra.mrb[0].mxu0 %vm403_vm1, %v382_v17  ;;  %v479_v19 = vld [vmem:[%s374_s24] sm:$0xff]  ;;  %s784_s25 = sshll.u32 %s358_s12, 3  ;;  %s664_s23 = scalar_lea.sflag [#allocation3], %s358_s12 }
  0x1c   : > { %816 = vmatpush3.msk.msra.mxu0 %vm503_vm2, %v498_v18  ;;  %817 = vmatprep.mubr.msk.f32.mxu0 %vm1032_vm0, %v1031_v7  ;;  %v480_v42 = vld [vmem:[%s381_s22] sm:$0xff]  ;;  %s360_s16 = scalar_lea.vmem [#allocation2], %s784_s25  ;;  %s1241_s22 = scalar_lea.hbm %s1297_s8, %s793_s14 }
  0x1d   : > { %871 = vmatpush3.bf16.msra.mxu1 %v870_v26  ;;  %658 = vperm.xlu0 %946, %v480_v42   ;;  %s678_s19 = sshll.u32 %s360_s16, 4  ;;  %s955_s25 = sshll.u32 %s1035_s30, 4  ;;  %s1243_s19 = int_to_ptr.vmem [resolvable:$true] %s678_s19  ;;  %s956_s25 = int_to_ptr.vmem [resolvable:$false] %s955_s25 }
  0x1e   : > { %872 = vmatprep.subr.bf16.mxu1 %v1033_v12  ;;  %s951_s24 = scalar_lea.vmem %s1243_s19, 128  ;;  %s957_s26 = scalar_lea.vmem %s956_s25, 256 }
  0x1f   : > { %818 = vmatmul.mubr.msk.f32.vlgmr.msra.gmra.mrb[2].mxu0 %vm499_vm3, %v479_v19  ;;  %p952_p12 = scmp.ne.s32.totalorder %s1243_s19, %s951_s24  ;;  %p958_p1 = scmp.lt.s32.totalorder %s1243_s19, %s956_s25 }
  0x20   : > { %p959_p2 = scmp.lt.s32.totalorder %s957_s26, %s951_s24 }
  0x21   : > { %874 = vmatpush3.bf16.msra.mxu1 %v873_v28  ;;  %p953_p13 = pnand %p952_p12, %p1121_p4 }
  0x22   : > { %875 = vmatprep.subr.bf16.mxu1 %v1033_v12  ;;  %p960_p3 = por %p959_p2, %p958_p1 }
  0x23   : > { %p954_p0 = pneg %p953_p13 }
  0x25   : > { %877 = vmatpush3.bf16.msra.mxu1 %v876_v31  ;;  %p961_p5 = pnand %p960_p3, %p954_p0 }
  0x26   : > { %878 = vmatprep.subr.bf16.mxu1 %v1033_v12 }
  0x29   : > { %880 = vmatpush3.bf16.msra.mxu1 %v879_v34 }
  0x2a   : > { %881 = vmatprep.subr.bf16.mxu1 %v1033_v12 }
  0x2d   : > { %883 = vmatpush3.bf16.msra.mxu1 %v882_v37 }
  0x2e   : > { %884 = vmatprep.subr.bf16.mxu1 %v1033_v12 }
  0x31   : > { %886 = vmatpush3.bf16.msra.mxu1 %v885_v40 }
  0x9c   : > { %v659_v62 = vpop.permute.xlu0 %658 }
  0xee   : > { %v473_v48 = vpop.f32.mrb[0].mxu0 }
  0xef   : > { %v474_v49 = vadd.f32 %v473_v48, %v396_v47  ;;  %v475_v50 = vpop.f32.mrb[1].mxu0 }
  0xf0   : > { %v476_v56 = vadd.f32 %v475_v50, %v400_v54 }
  0xf1   : > { %947 = vtanh.f32 %v474_v49 }
  0xf2   : > { %v573_v51 = vpop.f32.mrb[2].mxu0 }
  0xf3   : > { %v819_v52 = vpop.f32.mrb[3].mxu0 }
  0xfb   : > { %v948_v55 = vpop.eup %947 }
  0xfc   : > { %v577_v57 = vmul.f32 %v948_v55, %v573_v51 }
  0xfe   : > { %v578_v58 = vadd.f32 %v577_v57, %v476_v56 }
 0x100   : > { %949 = vtanh.f32 %v578_v58 }
 0x10a   : > { %v950_v59 = vpop.eup %949 }
 0x10b   : > { %853 = vmatmul.mubr.f32.vlgmr.msra.gmra.mrb[0].mxu1 %v950_v59 }
 0x1de   : > { %v652_v61 = vpop.f32.mrb[0].mxu1 }
 0x1df   : > { %v653_v63 = vadd.f32 %v791_v60, %v652_v61  ;;  %v854_v0 = vpop.f32.mrb[1].mxu1 }
 0x1e1   : > { %v661_v1 = vmul.f32 %v659_v62, %v653_v63 }
 0x1e3   : > { %662 = vst.msk [vmem:[%s360_s16] sm:$0xff] %vm403_vm1, %v661_v1 }
 0x1e4   : > { %964 = shalt.err (!%p961_p5)
}
 0x1e5   : > { %s965_s12 = scalar_lea.hbm %s1241_s22, 128  ;;  %s969_s16 = scalar_lea.hbm %s1297_s8, 256 }
 0x1e6   : > { %p966_p6 = scmp.ne.s32.totalorder %s1241_s22, %s965_s12  ;;  %p970_p10 = scmp.lt.u32.totalorder %s1241_s22, %s1297_s8 }
 0x1e7   : > { %p971_p11 = scmp.lt.u32.totalorder %s969_s16, %s965_s12  ;;  %p973_p13 = scmp.lt.u32.totalorder %s965_s12, %s1241_s22 }
 0x1e8   : > { %p967_p7 = pnand %p966_p6, %p1121_p4 }
 0x1e9   : > { %p972_p12 = por %p971_p11, %p970_p10 }
 0x1ea   : > { %p968_p9 = pneg %p967_p7 }
 0x1eb   : > { %p974_p0 = por %p973_p13, %p972_p12 }
 0x1ed   : > { %p975_p1 = pnand %p974_p0, %p968_p9 }
 0x1ef   : > { %978 = shalt.err (!%p975_p1)
}
 0x1f0   : > { %887 = dma.vmem_to_hbm [thread:$0]  (%p1121_p4), %s1243_s19, 128, %s1241_s22, %s664_s23  }
 0x1f1 PF: > { %p893_p2 = scmp.ge.s32.totalorder %s1029_s10, 2  ;;  %s690_s24 = sand.u32 1, %s1009_s27  }
 0x1f2   : > { %s691_s30 = scalar_lea.sflag [#allocation3], %s690_s24 }
 0x1f3   : > { %p890_p3 = pnand %p893_p2, %p1128_p8 }
 0x1f5   : > { %1004 = dma.done.wait (!%p890_p3), %s691_s30, 128  }
 0x1f6   : > { %1006 = vsyncadd (!%p890_p3), %s691_s30, 4294967168  ;;  %s21_s10 = sadd.s32 1, %s1029_s10   ;;  %s1300_s27 = smov %s1013_s28 }
 0x1f7   : > { %p18_p5 = scmp.ge.s32.totalorder %s21_s10, 4   ;;  %s1301_s28 = smov %s1017_s29 }
 0x1f8   : > { %s1302_s29 = smov %s1134_s18  ;;  %s1303_s30 = smov %s1025_s9 }
 0x1f9   : > { %s1304_s9 = smov %s1306_s13  ;;  %20 = sbr.rel (!%p18_p5) target bundleno = 4 (0x4), region = 93 }
 0x200   :  { %696 = vsyncpa [#allocation3], 1 }
 0x201   :  { %698 = vsyncpa [#allocation3 + $0x1], 1 }

</bundles_post_ra>
